<compile_context>
chip_gen: v5e
topology: v5e:2x2
jax: 0.10.0
libtpu: 0.0.40
codegen_flags: <defaults>
</compile_context>

<pallas_src>
import jax
import jax.numpy as jnp
from jax.experimental import pallas as pl
from jax.experimental.pallas import tpu as pltpu


def _proj_kernel(x_ref, w_ref, b_ref, o_ref):
    # x_ref: (C_in, TN)  w_ref: (C_out, C_in)  b_ref: (C_out, 1)  o_ref: (C_out, TN)
    acc = jnp.dot(w_ref[...], x_ref[...], preferred_element_type=jnp.float32)
    o_ref[...] = (acc + b_ref[...]).astype(o_ref.dtype)


def _pick_lane_tile(hw, bytes_per_lane, max_lanes=16384,
                    vmem_budget_bytes=12 * 1024 * 1024):
    """Pixel (lane) tile width.

    A multiple of 128 whenever hw > 128, sized so the double-buffered
    activation + output blocks stay under `vmem_budget_bytes` (safe for the
    default scoped-VMEM limit of every TPU generation), capped at `max_lanes`.
    """
    if hw <= 128:
        return hw                      # tiny image: single (possibly masked) tile
    tn = min(max_lanes, vmem_budget_bytes // bytes_per_lane, hw)
    tn -= tn % 128
    return max(tn, 128)


def patch_unembed(x_nchw, weight, bias, patch_size, out_chans, kernel_size=1):
    """PatchUnEmbed forward.

    x_nchw: (B, C_in, H, W); weight: (C_out, C_in) = squeezed 1x1 Conv2d weight;
    bias: (C_out,).  Returns (B, out_chans, H*patch_size, W*patch_size), NCHW.
    """
    if kernel_size != 1:
        # TODO(synk): kernel_size > 1 (reflect-padded conv) path not implemented.
        raise NotImplementedError("only the default 1x1 projection path is supported")

    B, C_in, H, W = x_nchw.shape
    C_out = weight.shape[0]
    assert C_out == out_chans * patch_size * patch_size
    assert weight.shape == (C_out, C_in)
    assert bias.shape == (C_out,)

    HW = H * W
    elt = x_nchw.dtype.itemsize
    # Double-buffered input + output block bytes per lane column.
    bytes_per_lane = 2 * (C_in + C_out) * elt
    TN = _pick_lane_tile(HW, bytes_per_lane)
    n_tiles = pl.cdiv(HW, TN)

    # Make sure v7x's two TensorCores both get work when the image allows it.
    if B * n_tiles < 2 and HW > 256:
        TN = max(128, (-(-HW // 2) + 127) // 128 * 128)
        n_tiles = pl.cdiv(HW, TN)

    # Free reshape (no transpose, no extra HBM round trip).
    x_rows = x_nchw.reshape(B, C_in, HW)
    b2d = bias.reshape(C_out, 1)

    cost = pl.CostEstimate(
        flops=2 * B * HW * C_in * C_out,
        transcendentals=0,
        bytes_accessed=(B * C_in * HW * elt          # activation read
                        + B * C_out * HW * elt       # projection write
                        + weight.size * weight.dtype.itemsize
                        + bias.size * bias.dtype.itemsize),
    )

    y_rows = pl.pallas_call(
        _proj_kernel,
        out_shape=jax.ShapeDtypeStruct((B, C_out, HW), x_nchw.dtype),
        grid_spec=pltpu.PrefetchScalarGridSpec(
            num_scalar_prefetch=0,
            grid=(B, n_tiles),
            in_specs=[
                # Activation: pixels (lanes) tiled, batch squeezed.  The cdiv
                # grid lets Pallas clip the boundary block when TN does not
                # divide HW; columns are independent so the result is exact.
                pl.BlockSpec((None, C_in, TN), lambda b, j: (b, 0, j)),
                # Weight & bias: tiny, constant block index -> VMEM-resident.
                pl.BlockSpec((C_out, C_in), lambda b, j: (0, 0)),
                pl.BlockSpec((C_out, 1), lambda b, j: (0, 0)),
            ],
            out_specs=pl.BlockSpec((None, C_out, TN), lambda b, j: (b, 0, j)),
        ),
        compiler_params=pltpu.CompilerParams(
            dimension_semantics=("parallel", "parallel")),
        cost_estimate=cost,
    )(x_rows, weight, b2d)

    # PixelShuffle(r): out[b, c, h*r+i, w*r+j] = y[b, c*r*r + i*r + j, h, w].
    # TODO(synk): fusing this permutation into the kernel needs a lane<->sublane
    # interleave at granularity r (pixels move lanes->rows, the (i,j) sub-pixel
    # index moves rows->lanes) with no robust Mosaic lowering; it is left to XLA
    # as a single layout pass on the projection output.
    r = patch_size
    y = y_rows.reshape(B, out_chans, r, r, H, W)       # (b, c, i, j, h, w)
    y = jnp.transpose(y, (0, 1, 4, 2, 5, 3))           # (b, c, h, i, w, j)
    return y.reshape(B, out_chans, H * r, W * r)       # NCHW output


def _reference(x, weight, bias, patch_size, out_chans):
    B, C_in, H, W = x.shape
    conv = jnp.einsum("oc,bchw->bohw", weight, x) + bias[None, :, None, None]
    ref = conv.reshape(B, out_chans, patch_size, patch_size, H, W)
    ref = jnp.transpose(ref, (0, 1, 4, 2, 5, 3))
    return ref.reshape(B, out_chans, H * patch_size, W * patch_size)


if __name__ == "__main__":
    patch_size = 4
    out_chans = 3
    embed_dim = 32
    C_out = out_chans * patch_size ** 2  # 48

    key = jax.random.PRNGKey(0)
    kx, kw, kb, kx2 = jax.random.split(key, 4)
    # PyTorch-style 1x1 conv weight (C_out, C_in) and bias (C_out,).
    weight = jax.random.normal(kw, (C_out, embed_dim), dtype=jnp.float32) * 0.02
    bias = jax.random.normal(kb, (C_out,), dtype=jnp.float32) * 0.02

    # Case 1: 128-aligned pixel count (B=2, 16x16).
    x = jax.random.normal(kx, (2, embed_dim, 16, 16), dtype=jnp.float32)
    out = jax.block_until_ready(patch_unembed(x, weight, bias, patch_size, out_chans))
    ref = _reference(x, weight, bias, patch_size, out_chans)
    assert out.shape == (2, out_chans, 64, 64)
    assert jnp.allclose(out, ref, atol=1e-4, rtol=1e-4)

    # Case 2: pixel count not a multiple of 128 (exercises the cdiv/clipped grid
    # path that replaced the old TN=HW fallback).
    x2 = jax.random.normal(kx2, (1, embed_dim, 18, 20), dtype=jnp.float32)
    out2 = jax.block_until_ready(patch_unembed(x2, weight, bias, patch_size, out_chans))
    ref2 = _reference(x2, weight, bias, patch_size, out_chans)
    assert out2.shape == (1, out_chans, 72, 80)
    assert jnp.allclose(out2, ref2, atol=1e-4, rtol=1e-4)

    print("KERNEL_OK")
</pallas_src>

<mosaic_0001>
module attributes {stable_mosaic.version = 11 : i64} {
  func.func @_proj_kernel(%arg0: i32, %arg1: i32, %arg2: memref<1x32x256xf32, #tpu.memory_space<vmem>>, %arg3: memref<48x32xf32, #tpu.memory_space<vmem>>, %arg4: memref<48x1xf32, #tpu.memory_space<vmem>>, %arg5: memref<1x48x256xf32, #tpu.memory_space<vmem>>) attributes {dimension_semantics = [#tpu.dimension_semantics<parallel>, #tpu.dimension_semantics<parallel>], iteration_bounds = array<i64: 2, 1>, scalar_prefetch = 0 : i64, scratch_operands = 0 : i64, tpu.core_type = #tpu.core_type<tc>, window_params = [{transform_indices = @transform_0, window_bounds = array<i64: 1, 32, 256>}, {pipeline_mode = #tpu.pipeline_mode<synchronous>, transform_indices = @transform_1, window_bounds = array<i64: 48, 32>}, {pipeline_mode = #tpu.pipeline_mode<synchronous>, transform_indices = @transform_2, window_bounds = array<i64: 48, 1>}, {transform_indices = @transform_3, window_bounds = array<i64: 1, 48, 256>}]} {
    %c0 = arith.constant 0 : index
    %c0_0 = arith.constant 0 : index
    %0 = vector.load %arg3[%c0, %c0_0] : memref<48x32xf32, #tpu.memory_space<vmem>>, vector<48x32xf32>
    %c0_1 = arith.constant 0 : index
    %c0_2 = arith.constant 0 : index
    %c0_3 = arith.constant 0 : index
    %1 = vector.load %arg2[%c0_1, %c0_2, %c0_3] : memref<1x32x256xf32, #tpu.memory_space<vmem>>, vector<1x32x256xf32>
    %2 = vector.shape_cast %1 : vector<1x32x256xf32> to vector<32x256xf32>
    %cst = arith.constant dense<0.000000e+00> : vector<48x256xf32>
    %3 = tpu.matmul %0, %2, %cst {dimension_numbers = #tpu.dot_dimension_numbers<[1], [0], [0], [1], [0, 0, 1, 1], [], []>} : vector<48x32xf32>, vector<32x256xf32>, vector<48x256xf32> -> vector<48x256xf32>
    %c0_4 = arith.constant 0 : index
    %c0_5 = arith.constant 0 : index
    %4 = vector.load %arg4[%c0_4, %c0_5] : memref<48x1xf32, #tpu.memory_space<vmem>>, vector<48x1xf32>
    %5 = vector.broadcast %4 : vector<48x1xf32> to vector<48x256xf32>
    %6 = arith.addf %3, %5 : vector<48x256xf32>
    %c0_6 = arith.constant 0 : index
    %c0_7 = arith.constant 0 : index
    %c0_8 = arith.constant 0 : index
    %7 = vector.load %arg5[%c0_6, %c0_7, %c0_8] : memref<1x48x256xf32, #tpu.memory_space<vmem>>, vector<1x48x256xf32>
    %8 = vector.shape_cast %7 : vector<1x48x256xf32> to vector<48x256xf32>
    %9 = vector.shape_cast %6 : vector<48x256xf32> to vector<1x48x256xf32>
    tpu.vector_store %arg5[%c0_6, %c0_7, %c0_8], %9 {strides = array<i32>} : memref<1x48x256xf32, #tpu.memory_space<vmem>>, vector<1x48x256xf32>,
    return
  }
  func.func @transform_0(%arg0: i32, %arg1: i32) -> (i32, i32, i32) {
    %c0_i32 = arith.constant 0 : i32
    %c0_i32_0 = arith.constant 0 : i32
    return %arg0, %c0_i32, %arg1 : i32, i32, i32
  }
  func.func @transform_1(%arg0: i32, %arg1: i32) -> (i32, i32) {
    %c0_i32 = arith.constant 0 : i32
    %c0_i32_0 = arith.constant 0 : i32
    %c0_i32_1 = arith.constant 0 : i32
    return %c0_i32, %c0_i32_0 : i32, i32
  }
  func.func @transform_2(%arg0: i32, %arg1: i32) -> (i32, i32) {
    %c0_i32 = arith.constant 0 : i32
    %c0_i32_0 = arith.constant 0 : i32
    %c0_i32_1 = arith.constant 0 : i32
    return %c0_i32, %c0_i32_0 : i32, i32
  }
  func.func @transform_3(%arg0: i32, %arg1: i32) -> (i32, i32, i32) {
    %c0_i32 = arith.constant 0 : i32
    %c0_i32_0 = arith.constant 0 : i32
    return %arg0, %c0_i32, %arg1 : i32, i32, i32
  }
}

</mosaic_0001>

<bundles_post_ra>
// kernel: tpu_custom_call.1
= control target key start
LH: loop header
LB: loop body
LE: loop exit
PB: predicated region body
PF: predicated region fallthrough
CT: control target
= control target key end

     0   :  { %8 = vsyncpa [#allocation3], 0  ;;  %s809_s0 = inlined_call_operand.vmem [shape: f32[2,32,256], index: 0, kind: input, shape index: {}]   ;;  %s810_s1 = inlined_call_operand.vmem [shape: f32[48,32], index: 1, kind: input, shape index: {}]   ;;  %s811_s2 = inlined_call_operand.vmem [shape: f32[48,1], index: 2, kind: input, shape index: {}]   ;;  %s812_s3 = inlined_call_operand.hbm [shape: f32[2,48,256], index: 3, kind: output, shape index: {}]  }
   0x1   :  { %10 = vsyncpa [#allocation3 + $0x1], 0  ;;  %s645_s12 = smov 0   ;;  %s647_s13 = smov 0  }
   0x2   :  { %s649_s14 = smov 0   ;;  %s651_s15 = smov 0  }
   0x3   :  { %s653_s16 = smov 0   ;;  %s655_s17 = smov 0  }
   0x4 LB: > { %s448_s18 = sadd.s32 4294967295, %s620_s17   ;;  %s449_s19 = sadd.s32 4294967294, %s620_s17   ;;  %s620_s17 = sphi %s655_s17, %s16_s17   ;;  %s616_s16 = sphi %s653_s16, %s819_s16   ;;  %s612_s15 = sphi %s651_s15, %s818_s15   ;;  %s608_s14 = sphi %s649_s14, %s817_s14   ;;  %s604_s13 = sphi %s647_s13, %s816_s13   ;;  %s600_s12 = sphi %s645_s12, %s815_s12  }
   0x5   : > { %s28_s20 = sadd.s32 1, %s616_s16  ;;  %s107_s21 = sadd.s32 1, %s608_s14 }
   0x6   : > { %p30_p0 = scmp.ge.s32.totalorder %s28_s20, 2  ;;  %p117_p1 = scmp.ne.s32.totalorder %s608_s14, %s604_s13 }
   0x7   : > { %p118_p2 = scmp.eq.s32.totalorder %s448_s18, 1  ;;  %p123_p3 = scmp.ne.s32.totalorder %s604_s13, %s600_s12 }
   0x8   : > { %s821_s20 = smov (%p30_p0, %s28_s20), 0  ;;  %p124_p5 = scmp.eq.s32.totalorder %s449_s19, 1 }
   0x9   : > { %p685_p4 = por %p118_p2, %p117_p1  ;;  %s102_s23 = ssub.s32 %s616_s16, %s821_s20 }
   0xa   : > { %p452_p6 = scmp.ge.s32.totalorder %s620_s17, 1  ;;  %p105_p7 = scmp.eq.s32.totalorder %s102_s23, 0 }
   0xb   : > { %p692_p8 = por %p124_p5, %p123_p3  ;;  %p161_p9 = scmp.lt.s32.totalorder %s620_s17, 3 }
   0xc   : > { %s698_s25 = scalar_select %p105_p7, %s608_s14, %s107_s21  }
   0xd   : > { %p162_p10 = pnand %p452_p6, %p161_p9 }
   0xe   : > { %p190_p11 = scmp.lt.s32.totalorder (!%p162_p10), %s612_s15, 1  ;;  %s186_s11 = sand.u32 (!%p162_p10), 1, %s604_s13  }
   0xf   : > { %165 = sbr.rel (%p162_p10) target bundleno = 188 (0xbc), region = 32  ;;  %s352_s29 = scalar_lea.sflag (!%p162_p10), [#allocation3], %s186_s11 }
  0x10   : > { %s479_s18 = smul.u32 (!%p162_p10), 96, %s186_s11  ;;  %s562_s7 = scalar_lea.hbm (!%p162_p10), %s812_s3, 192 }
  0x11   : > { %s480_s21 = smul.u32 (!%p162_p10), 96, %s612_s15 }
  0x12   : > { %s756_s19 = scalar_lea.vmem (!%p162_p10), [#allocation2], %s479_s18 }
  0x13   : > { %s365_s27 = scalar_lea.hbm (!%p162_p10), %s812_s3, %s480_s21 }
  0x14   : > { %v622_v0 = vmov 0   ;;  %v216_v1 = vld [vmem:[%s811_s2 + $0x10] sm:$0xff]  ;;  %s191_s28 = scalar_select %p190_p11, %s612_s15, 1  ;;  %v214_v2 = vld [vmem:[%s811_s2] sm:$0xff]  ;;  %vm250_vm0 = vcmask 261120   ;;  %v203_v13 = vld [vmem:[%s810_s1 + $0x18] sm:$0xff] }
  0x15   : > { %540 = vset.pattern.permute.xlu1 %v622_v0  ;;  %539 = vset.pattern.permute.xlu0 %v622_v0  ;;  %v218_v3 = vld [vmem:[%s811_s2 + $0x20] sm:$0xff]  ;;  %v217_v14 = vld [vmem:[%s811_s2 + $0x18] sm:$0xff]  ;;  %v215_v15 = vld [vmem:[%s811_s2 + $0x8] sm:$0xff]  ;;  %s366_s15 = sshll.u32 %s756_s19, 4  ;;  %s367_s15 = int_to_ptr.vmem [resolvable:$true] %s366_s15 }
  0x16   : > { %232 = vperm.xlu1 %540, %v216_v1   ;;  %541 = vset.pattern.permute.xlu2 %v622_v0  ;;  %s470_s6 = sshll.u32 %s191_s28, 6  ;;  %v200_v12 = vld [vmem:[%s810_s1] sm:$0xff]  ;;  %v219_v16 = vld [vmem:[%s811_s2 + $0x28] sm:$0xff]  ;;  %v202_v19 = vld [vmem:[%s810_s1 + $0x10] sm:$0xff]  ;;  %s368_s28 = sshll.u32 %s365_s27, 4  ;;  %s369_s28 = int_to_ptr.hbm [resolvable:$true] %s368_s28 }
  0x17   : > { %222 = vperm.xlu0 %539, %v214_v2   ;;  %242 = vperm.xlu2 %541, %v218_v3   ;;  %s197_s9 = scalar_lea.vmem %s809_s0, %s470_s6  ;;  %v201_v17 = vld [vmem:[%s810_s1 + $0x8] sm:$0xff]  ;;  %v204_v18 = vld [vmem:[%s810_s1 + $0x20] sm:$0xff]  ;;  %s556_s30 = sshra.s32 %s369_s28, 4  ;;  %s557_s30 = int_to_ptr.hbm [resolvable:$true] %s556_s30 }
  0x18   : > { %v212_v4 = vld [vmem:[%s197_s9 + $0x30] sm:$0xff]  ;;  %v213_v5 = vld [vmem:[%s197_s9 + $0x38] sm:$0xff]  ;;  %v210_v6 = vld [vmem:[%s197_s9 + $0x20] sm:$0xff]  ;;  %s558_s4 = scalar_lea.hbm %s557_s30, 96  ;;  %p563_p1 = scmp.lt.s32.totalorder %s557_s30, %s812_s3 }
  0x19   : > { %281 = vmatpush.msra.mxu0 %v212_v4  ;;  %471 = vmatpush.msra.mxu2 %v212_v4  ;;  %v211_v7 = vld [vmem:[%s197_s9 + $0x28] sm:$0xff]  ;;  %v208_v8 = vld [vmem:[%s197_s9 + $0x10] sm:$0xff]  ;;  %v209_v9 = vld [vmem:[%s197_s9 + $0x18] sm:$0xff]  ;;  %p559_p12 = scmp.ne.s32.totalorder %s557_s30, %s558_s4  ;;  %p564_p2 = scmp.lt.s32.totalorder %s562_s7, %s558_s4 }
  0x1a   : > { %316 = vmatpush.msra.mxu1 %v213_v5  ;;  %475 = vmatpush.msra.mxu3 %v213_v5  ;;  %v206_v10 = vld [vmem:[%s197_s9] sm:$0xff]  ;;  %v207_v11 = vld [vmem:[%s197_s9 + $0x8] sm:$0xff] }
  0x1b   : > { %282 = vmatpush.msra.mxu0 %v210_v6  ;;  %472 = vmatpush.msra.mxu2 %v210_v6  ;;  %v205_v20 = vld [vmem:[%s810_s1 + $0x28] sm:$0xff]  ;;  %p560_p13 = pnand %p559_p12, %p685_p4  ;;  %p565_p3 = por %p564_p2, %p563_p1 }
  0x1c   : > { %317 = vmatpush.msra.mxu1 %v211_v7  ;;  %476 = vmatpush.msra.mxu3 %v211_v7 }
  0x1d   : > { %283 = vmatpush.msra.mxu0 %v208_v8  ;;  %473 = vmatpush.msra.mxu2 %v208_v8  ;;  %p561_p0 = pneg %p560_p13 }
  0x1e   : > { %318 = vmatpush.msra.mxu1 %v209_v9  ;;  %477 = vmatpush.msra.mxu3 %v209_v9 }
  0x1f   : > { %284 = vmatpush.msra.mxu0 %v206_v10  ;;  %474 = vmatpush.msra.mxu2 %v206_v10  ;;  %p566_p5 = pnand %p565_p3, %p561_p0 }
  0x20   : > { %319 = vmatpush.msra.mxu1 %v207_v11  ;;  %478 = vmatpush.msra.mxu3 %v207_v11 }
  0x21   : > { %455 = vmatmul.msk.f32.vlgmr.msra.gmra.mxu0 %vm250_vm0, %v200_v12  ;;  %458 = vmatmul.msk.f32.vlgmr.msra.gmra.mxu2 %vm250_vm0, %v203_v13 }
  0x22   : > { %461 = vmatmul.msk.f32.vlgmr.msra.gmra.mxu1 %vm250_vm0, %v200_v12  ;;  %464 = vmatmul.msk.f32.vlgmr.msra.gmra.mxu3 %vm250_vm0, %v203_v13 }
  0x23   : > { %237 = vperm.xlu1 %540, %v217_v14   ;;  %227 = vperm.xlu0 %539, %v215_v15  }
  0x24   : > { %247 = vperm.xlu2 %541, %v219_v16  }
  0x29   : > { %456 = vmatmul.msk.f32.gmra.mxu0 %vm250_vm0, %v201_v17  ;;  %459 = vmatmul.msk.f32.gmra.mxu2 %vm250_vm0, %v204_v18 }
  0x2a   : > { %462 = vmatmul.msk.f32.gmra.mxu1 %vm250_vm0, %v201_v17  ;;  %465 = vmatmul.msk.f32.gmra.mxu3 %vm250_vm0, %v204_v18 }
  0x31   : > { %457 = vmatmul.msk.f32.gmra.mxu0 %vm250_vm0, %v202_v19  ;;  %460 = vmatmul.msk.f32.gmra.mxu2 %vm250_vm0, %v205_v20 }
  0x32   : > { %463 = vmatmul.msk.f32.gmra.mxu1 %vm250_vm0, %v202_v19  ;;  %466 = vmatmul.msk.f32.gmra.mxu3 %vm250_vm0, %v205_v20 }
  0x71   : > { %v243_v37 = vpop.permute.xlu2 %242 }
  0x7e   : > { %v248_v46 = vpop.permute.xlu2 %247 }
  0x88   : > { %v233_v21 = vpop.permute.xlu1 %232 }
  0x89   : > { %v223_v22 = vpop.permute.xlu0 %222 }
  0x95   : > { %v238_v27 = vpop.permute.xlu1 %237  ;;  %v228_v29 = vpop.permute.xlu0 %227 }
  0x9e   : > { %v286_v23 = vpop.f32.mrf.mxu0 }
  0x9f   : > { %v321_v24 = vpop.f32.mrf.mxu1  ;;  %v287_v25 = vadd.f32 %v286_v23, %v223_v22 }
  0xa0   : > { %v322_v26 = vadd.f32 %v321_v24, %v223_v22 }
  0xa1   : > { %339 = vst [vmem:[%s756_s19] sm:$0xff] %v287_v25 }
  0xa2   : > { %340 = vst [vmem:[%s756_s19 + $0x8] sm:$0xff] %v322_v26 }
  0xa4   : > { %v295_v28 = vpop.f32.mrf.mxu2 }
  0xa5   : > { %v296_v30 = vadd.f32 %v295_v28, %v238_v27  ;;  %v330_v31 = vpop.f32.mrf.mxu3 }
  0xa6   : > { %v331_v32 = vadd.f32 %v330_v31, %v238_v27  ;;  %v289_v33 = vpop.f32.mrf.mxu0 }
  0xa7   : > { %345 = vst [vmem:[%s756_s19 + $0x30] sm:$0xff] %v296_v30  ;;  %v324_v34 = vpop.f32.mrf.mxu1  ;;  %v290_v35 = vadd.f32 %v289_v33, %v228_v29 }
  0xa8   : > { %346 = vst [vmem:[%s756_s19 + $0x38] sm:$0xff] %v331_v32  ;;  %v325_v36 = vadd.f32 %v324_v34, %v228_v29 }
  0xa9   : > { %341 = vst [vmem:[%s756_s19 + $0x10] sm:$0xff] %v290_v35 }
  0xaa   : > { %342 = vst [vmem:[%s756_s19 + $0x18] sm:$0xff] %v325_v36 }
  0xac   : > { %v298_v38 = vpop.f32.mrf.mxu2 }
  0xad   : > { %v299_v39 = vadd.f32 %v298_v38, %v243_v37  ;;  %v333_v40 = vpop.f32.mrf.mxu3 }
  0xae   : > { %v334_v41 = vadd.f32 %v333_v40, %v243_v37  ;;  %v292_v42 = vpop.f32.mrf.mxu0 }
  0xaf   : > { %347 = vst [vmem:[%s756_s19 + $0x40] sm:$0xff] %v299_v39  ;;  %v293_v43 = vadd.f32 %v292_v42, %v233_v21  ;;  %v327_v44 = vpop.f32.mrf.mxu1 }
  0xb0   : > { %348 = vst [vmem:[%s756_s19 + $0x48] sm:$0xff] %v334_v41  ;;  %v328_v45 = vadd.f32 %v327_v44, %v233_v21 }
  0xb1   : > { %343 = vst [vmem:[%s756_s19 + $0x20] sm:$0xff] %v293_v43 }
  0xb2   : > { %344 = vst [vmem:[%s756_s19 + $0x28] sm:$0xff] %v328_v45 }
  0xb4   : > { %v301_v47 = vpop.f32.mrf.mxu2 }
  0xb5   : > { %v302_v48 = vadd.f32 %v301_v47, %v248_v46  ;;  %v336_v49 = vpop.f32.mrf.mxu3 }
  0xb6   : > { %v337_v50 = vadd.f32 %v336_v49, %v248_v46 }
  0xb7   : > { %349 = vst [vmem:[%s756_s19 + $0x50] sm:$0xff] %v302_v48 }
  0xb8   : > { %350 = vst [vmem:[%s756_s19 + $0x58] sm:$0xff] %v337_v50 }
  0xb9   : > { %569 = shalt.err (!%p566_p5)
}
  0xba   : > { %s623_s10 = smov 256   ;;  %s624_s11 = smov 16  }
  0xbb   : > { %481 = dma.vmem_to_hbm [thread:$0]  (%p685_p4), %s367_s15, 1536, %s369_s28, %s352_s29, %s623_s10, %s623_s10, %s624_s11  }
  0xbc PF: > { %p487_p6 = scmp.ge.s32.totalorder %s620_s17, 2  ;;  %s383_s18 = sand.u32 1, %s600_s12  }
  0xbd   : > { %s384_s19 = scalar_lea.sflag [#allocation3], %s383_s18 }
  0xbe   : > { %p484_p7 = pnand %p487_p6, %p692_p8 }
  0xc0   : > { %p485_p9 = pneg %p484_p7 }
  0xc2   : > { %595 = dma.done.wait (%p485_p9), %s384_s19, 1536  }
  0xc3   : > { %597 = vsyncadd (%p485_p9), %s384_s19, 4294965760  ;;  %s16_s17 = sadd.s32 1, %s620_s17   ;;  %s815_s12 = smov %s604_s13 }
  0xc4   : > { %p13_p10 = scmp.ge.s32.totalorder %s16_s17, 4   ;;  %s816_s13 = smov %s608_s14 }
  0xc5   : > { %s817_s14 = smov %s698_s25  ;;  %s818_s15 = smov %s616_s16 }
  0xc6   : > { %s819_s16 = smov %s821_s20  ;;  %15 = sbr.rel (!%p13_p10) target bundleno = 4 (0x4), region = 67 }
  0xcb   :  { %390 = vsyncpa [#allocation3], 1 }
  0xcc   :  { %392 = vsyncpa [#allocation3 + $0x1], 1 }

</bundles_post_ra>
